<compile_context>
chip_gen: v7x
topology: tpu7x:2x2x1
jax: 0.10.0
libtpu: 0.0.40
codegen_flags: <defaults>
</compile_context>

<pallas_src>
import math
from functools import partial

import numpy as np
import jax
import jax.numpy as jnp
from jax import lax
from jax.experimental import pallas as pl
from jax.experimental.pallas import tpu as pltpu


# ----------------------------- Pallas kernels ------------------------------

def _bdy_kernel(lens_ref, logit_ref, prob_ref, score_ref, *, K, kern_flat, kern_total):
    # One grid step per video: fused masked softmax + K-wide sliding-window
    # Jensen-Shannon boundary score.  Classes live on sublanes, time on lanes,
    # so the score output (1, T) is lane-dense.
    b = pl.program_id(0)
    tlen = lens_ref[b]
    x = logit_ref[0]                                    # (C, T)
    c_dim, t_dim = x.shape
    center = K // 2
    ln2 = math.log(2.0)

    # softmax over classes (sublane reduction); exact reciprocal on the (1, T)
    # denominator (approx recip fed the host DP in the previous version).
    m = jnp.max(x, axis=0, keepdims=True)
    e = jnp.exp(x - m)
    s = jnp.sum(e, axis=0, keepdims=True)
    p = e * (1.0 / s)
    logp = (x - m) - jnp.log(s)                         # log-softmax, finite

    # zero frames beyond this video's valid length (== reference masked slice)
    col = lax.broadcasted_iota(jnp.int32, (c_dim, t_dim), 1)
    valid = col < tlen
    p = jnp.where(valid, p, 0.0)
    logp = jnp.where(valid, logp, 0.0)
    prob_ref[0] = p.astype(prob_ref.dtype)              # bf16 writeback / D2H

    # zero-padded lane buffers reproduce F.unfold's zero padding at both edges
    # exactly (the pad value of the log buffer is irrelevant: the matching
    # window probability is 0 there).
    zc = jnp.zeros((c_dim, center), jnp.float32)
    pp = jnp.concatenate([zc, p, zc], axis=1)           # (C, T + K - 1)
    lpp = jnp.concatenate([zc, logp, zc], axis=1)
    tp = t_dim + K - 1

    wins = [pp[:, k:k + t_dim] for k in range(K)]       # K static lane slices
    logw = [lpp[:, k:k + t_dim] for k in range(K)]

    # EUP sharing: log(m_{i,j}) for a pair (i, j) depends only on the gap
    # d = j - i up to a lane shift, so compute one log per gap over the padded
    # buffer and slice it per pair -> K-1 log passes instead of K(K-1)/2.
    log_base = {}
    for d in range(1, K):
        base = 0.5 * (pp[:, :tp - d] + pp[:, d:tp])
        log_base[d] = jnp.log(base + 1e-32)

    inv_ln2 = 1.0 / ln2
    acc = jnp.zeros((c_dim, t_dim), jnp.float32)
    # JS symmetry: one term per unordered pair (10 for K=5); the diagonal
    # (kl == 0 -> js == 1) is folded analytically into kern_total.
    for i in range(K):
        for j in range(i + 1, K):
            w_pair = 2.0 * kern_flat[i * K + j]
            if w_pair == 0.0:
                continue
            d = j - i
            log_m = log_base[d][:, i:i + t_dim]
            acc = acc + w_pair * (wins[i] * (logw[i] - log_m)
                                  + wins[j] * (logw[j] - log_m))
    r = jnp.sum(acc, axis=0, keepdims=True)             # (1, T): lane-dense
    score_ref[0] = (kern_total - r * inv_ln2) * (1.0 / (K * K))


def bdy_batch_pallas(logit_ct, lens, kern_np):
    """logit_ct: (B, C, T) f32; lens: (B,) int32.
    Returns (prob (B,C,T) bf16, score (B,1,T) f32)."""
    B, C, T = logit_ct.shape
    K = int(kern_np.shape[0])
    kern_flat = tuple(float(v) for v in np.asarray(kern_np).reshape(-1))
    kern_total = float(np.asarray(kern_np).sum())
    return pl.pallas_call(
        partial(_bdy_kernel, K=K, kern_flat=kern_flat, kern_total=kern_total),
        out_shape=(jax.ShapeDtypeStruct((B, C, T), jnp.bfloat16),
                   jax.ShapeDtypeStruct((B, 1, T), jnp.float32)),
        grid_spec=pltpu.PrefetchScalarGridSpec(
            num_scalar_prefetch=1,
            grid=(B,),
            in_specs=[pl.BlockSpec((1, C, T), lambda b, lens: (b, 0, 0))],
            out_specs=(pl.BlockSpec((1, C, T), lambda b, lens: (b, 0, 0)),
                       pl.BlockSpec((1, 1, T), lambda b, lens: (b, 0, 0)))),
        # TODO(synk): for very long videos add a lane-tiled inner loop with a
        # K-1 halo so the live (C, T) temporaries stay bounded on v7x (64 MiB).
        compiler_params=pltpu.CompilerParams(
            dimension_semantics=("parallel",),
            vmem_limit_bytes=48 * 1024 * 1024),
    )(lens.astype(jnp.int32), logit_ct.astype(jnp.float32))


def _frame_ce_kernel(logit_ref, lab_ref, w_ref, num_ref, den_ref, num_acc, den_acc):
    @pl.when(pl.program_id(1) == 0)
    def _():
        num_acc[...] = jnp.zeros_like(num_acc)
        den_acc[...] = jnp.zeros_like(den_acc)

    x = logit_ref[...]                                  # (tile, C)
    lab = lab_ref[...]                                  # (tile, 1) int32
    n, c = x.shape
    valid = (lab != -100).astype(jnp.float32)
    # target term built in-kernel from int labels (no dense one-hot DMA)
    onehot = (lax.broadcasted_iota(jnp.int32, (n, c), 1) == lab).astype(jnp.float32)
    m = jnp.max(x, axis=-1, keepdims=True)
    lse = jnp.log(jnp.sum(jnp.exp(x - m), axis=-1, keepdims=True)) + m
    tgt = jnp.sum(x * onehot, axis=-1, keepdims=True)
    ce = (lse - tgt) * valid                            # ignore_index -> 0 loss
    w = w_ref[...]
    num_acc[...] += jnp.sum(ce * w, keepdims=True)
    den_acc[...] += jnp.sum(w, keepdims=True)

    @pl.when(pl.program_id(1) == pl.num_programs(1) - 1)
    def _():
        num_ref[...] = num_acc[...].reshape(1, 1, 1)
        den_ref[...] = den_acc[...].reshape(1, 1, 1)


def _pick_ce_tile(n):
    # biggest tile (multiple of 8, up to 2048) such that both core-halves get
    # at least one tile; amortizes the ~0.35us per-grid-step overhead.
    for t in (2048, 1024, 512, 256, 128, 64, 32, 16, 8):
        if n >= 2 * t:
            return t
    return 8


def frame_ce_pallas(logits, labels, maskf, tile, n_half):
    # TODO(synk): a fully lane-dense (C, N) layout would add ~2.5x VPU/ld-st
    # efficiency but needs a host-side transpose of the (N, C) logits (2 extra
    # HBM passes on a mem-bound op), so the natural layout + big tiles is kept.
    npad, c = logits.shape
    num, den = pl.pallas_call(
        _frame_ce_kernel,
        out_shape=(jax.ShapeDtypeStruct((2, 1, 1), jnp.float32),
                   jax.ShapeDtypeStruct((2, 1, 1), jnp.float32)),
        grid=(2, n_half),
        in_specs=[pl.BlockSpec((tile, c), lambda h, i, nh=n_half: (h * nh + i, 0)),
                  pl.BlockSpec((tile, 1), lambda h, i, nh=n_half: (h * nh + i, 0)),
                  pl.BlockSpec((tile, 1), lambda h, i, nh=n_half: (h * nh + i, 0))],
        out_specs=(pl.BlockSpec((1, 1, 1), lambda h, i: (h, 0, 0)),
                   pl.BlockSpec((1, 1, 1), lambda h, i: (h, 0, 0))),
        scratch_shapes=[pltpu.VMEM((1, 1), jnp.float32),
                        pltpu.VMEM((1, 1), jnp.float32)],
        # leading axis splits the reduction across both TensorCores on v7x;
        # harmless sequential loop on single-TC v5e/v6e.
        compiler_params=pltpu.CompilerParams(
            dimension_semantics=("parallel", "arbitrary")),
    )(logits, labels, maskf)
    total_num = jnp.sum(num)
    total_den = jnp.maximum(jnp.sum(den), 1.0)          # guard fully-masked batch
    return total_num / total_den


def _contrast_kernel(fr_ref, seg_ref, tok_ref, lab_ref, rv_ref, o_ref, acc_ref, *, temp):
    tt = pl.program_id(1)

    @pl.when(tt == 0)
    def _():
        acc_ref[...] = jnp.zeros_like(acc_ref)

    # segment-sum of frame features: (L, tile_t) @ (tile_t, D) in bf16 on the
    # MXU, f32 accumulation.  (The reference's per-segment mean is sum/count;
    # the count cancels under L2 normalization, so `counts` was dropped.)
    acc_ref[...] += jnp.dot(seg_ref[0], fr_ref[0], preferred_element_type=jnp.float32)

    @pl.when(tt == pl.num_programs(1) - 1)
    def _():
        la = acc_ref[...]                               # (L, D) f32
        la = la * lax.rsqrt(jnp.maximum(jnp.sum(la * la, axis=-1, keepdims=True), 1e-24))
        tk = tok_ref[0]                                 # (C, D) f32
        tk = tk * lax.rsqrt(jnp.maximum(jnp.sum(tk * tk, axis=-1, keepdims=True), 1e-24))
        sim = lax.dot_general(la.astype(jnp.bfloat16), tk.astype(jnp.bfloat16),
                              (((1,), (1,)), ((), ())),
                              preferred_element_type=jnp.float32) * (1.0 / temp)
        m = jnp.max(sim, axis=-1, keepdims=True)
        lse = jnp.log(jnp.sum(jnp.exp(sim - m), axis=-1, keepdims=True)) + m
        tgt = jnp.sum(sim * lab_ref[0], axis=-1, keepdims=True)
        rv = rv_ref[0]                                  # (L, 1) valid-row mask
        ce = (lse - tgt) * rv
        o_ref[0] = (jnp.sum(ce, keepdims=True)
                    / jnp.maximum(jnp.sum(rv, keepdims=True), 1.0))


def contrast_pallas(fr_bf16, seg1h_bf16, tok, lab1h, rowvalid, temp, tile_t):
    B, Tp, D = fr_bf16.shape
    L = seg1h_bf16.shape[1]
    C = tok.shape[1]
    n_tt = Tp // tile_t
    return pl.pallas_call(
        partial(_contrast_kernel, temp=float(temp)),
        out_shape=jax.ShapeDtypeStruct((B, 1, 1), jnp.float32),
        grid=(B, n_tt),
        in_specs=[pl.BlockSpec((1, tile_t, D), lambda b, t: (b, t, 0)),
                  pl.BlockSpec((1, L, tile_t), lambda b, t: (b, 0, t)),
                  pl.BlockSpec((1, C, D), lambda b, t: (b, 0, 0)),
                  pl.BlockSpec((1, L, C), lambda b, t: (b, 0, 0)),
                  pl.BlockSpec((1, L, 1), lambda b, t: (b, 0, 0))],
        out_specs=pl.BlockSpec((1, 1, 1), lambda b, t: (b, 0, 0)),
        scratch_shapes=[pltpu.VMEM((L, D), jnp.float32)],
        compiler_params=pltpu.CompilerParams(
            dimension_semantics=("parallel", "arbitrary")),
    )(fr_bf16, seg1h_bf16, tok, lab1h, rowvalid)


# ---------------------------- host-side modules -----------------------------

class Args:
    alpha = 1.0
    beta = 1.0
    gamma = 0.5
    bdy_kernel = 5
    bdy_scale = 0.3
    cs_kernel = 5
    candidate_mul = 3
    warm_epc = 0
    cts_temp = 0.1
    bgw = 1.0
    dataset = 'breakfast'


class BoundaryDetectorPallas:
    def __init__(self, kernel_size, win_scale, args):
        self.kernel_size = kernel_size
        self.win_scale = win_scale
        self.args = args
        self.kernel = self._make_bdy_kernel(kernel_size)
        self.cs_size = args.cs_kernel
        cs_center = self.cs_size // 2
        k = np.zeros((self.cs_size, 2), np.float32)
        k[:cs_center, 0] = 1
        k[cs_center:, 0] = -1
        k[:cs_center, 1] = -1
        k[cs_center:, 1] = 1
        self.cls_score_kernel = k

    @staticmethod
    def _make_bdy_kernel(K):
        k = np.zeros((K, K), np.float32)
        c = K // 2
        k[:c, :c] = 1
        k[c:, c:] = 1
        k[:c, c:] = -1
        k[c:, :c] = -1
        k[c, c] = 0
        return k

    def get_cls_score(self, prob_np, tr, bdy_pts):
        # TODO(synk): tiny, candidate-index-driven scoring kept on host (numpy).
        K = self.cs_size
        center = K // 2
        kern = self.cls_score_kernel
        t = prob_np.shape[0]
        cs = []
        for ti in range(len(tr) - 1):
            a, b = tr[ti], tr[ti + 1]
            padp = np.zeros((t + 2 * center, 2), np.float32)
            padp[center:center + t] = prob_np[:, [a, b]]
            patches = np.stack([padp[j:j + K] for j in bdy_pts], axis=0)
            cs.append(np.mean(kern[None] * patches, axis=(-1, -2)))
        return np.stack(cs, axis=0)

    def dp(self, cls_score):
        # TODO(synk): sequential DP alignment stays on host (no Pallas equivalent).
        cost = -cls_score
        empty_cost = 0.0
        bdy_idx = []
        n_tr, n_x = cls_score.shape
        dist = np.full((n_x, 2 * n_tr + 1), np.inf, dtype=np.float64)
        dirm = np.zeros((n_x, 2 * n_tr + 1), dtype=np.int64)
        dist[:n_x - n_tr, 0] = empty_cost
        dist[:n_x - n_tr + 1, 1] = cost[0, :n_x - n_tr + 1]
        dirm[:n_x - n_tr + 1, 1] = 1
        for ii in range(1, n_x):
            for jj in range(2, 2 * n_tr + 1):
                if jj % 2 == 0:
                    if dist[ii - 1, jj] < dist[ii - 1, jj - 1]:
                        dist[ii, jj] = empty_cost + dist[ii - 1, jj]
                        dirm[ii, jj] = 0
                    else:
                        dist[ii, jj] = empty_cost + dist[ii - 1, jj - 1]
                        dirm[ii, jj] = 1
                elif dist[ii - 1, jj - 1] < dist[ii - 1, jj - 2]:
                    dist[ii, jj] = cost[jj // 2, ii] + dist[ii - 1, jj - 1]
                    dirm[ii, jj] = 1
                else:
                    dist[ii, jj] = cost[jj // 2, ii] + dist[ii - 1, jj - 2]
                    dirm[ii, jj] = 2
        cur_i = n_x - 1
        cur_j = 2 * n_tr if dist[-1, -1] < dist[-1, -2] else 2 * n_tr - 1
        while cur_i >= 0:
            if cur_j % 2 == 1:
                bdy_idx.append(cur_i)
            cur_j -= int(dirm[cur_i, cur_j])
            cur_i -= 1
        return list(reversed(bdy_idx))

    def find_bdy_pts_with_cls_transition(self, bdy_score, pt_num, window_len,
                                         prob_np, tr):
        # TODO(synk): greedy NMS candidate selection is data-dependent -> host.
        bdy_score = np.array(bdy_score, dtype=np.float64)
        backup = bdy_score.copy()
        t = len(bdy_score)
        cand = []
        for _ in range(self.args.candidate_mul * pt_num):
            idx = int(np.argmax(bdy_score))
            val = bdy_score[idx]
            if val == -np.inf:
                break
            cand.append(idx)
            left = max(0, idx - window_len)
            right = min(t, idx + window_len + 1)
            bdy_score[left:right] = -np.inf
        cand = np.sort(np.array(cand, dtype=np.int64))
        cls_score = self.get_cls_score(prob_np, tr, cand)
        cls_score = cls_score + np.repeat(backup[cand][None, :], len(tr) - 1, axis=0)
        optim_idx = self.dp(cls_score)
        bdy_pts = cand[np.array(optim_idx, dtype=np.int64)]
        assert len(bdy_pts) == pt_num
        return bdy_pts

    def forward(self, fr_logit, mask_np, transcript):
        # fr_logit: jnp (B, T, C);  mask_np: np bool (B, T)
        # TODO(synk): assumes mask is a contiguous prefix (the reference's
        # pseudo-label indexing relies on the same assumption).
        lens_np = mask_np.sum(axis=1).astype(np.int32)
        prob_ct, score = bdy_batch_pallas(jnp.swapaxes(fr_logit, 1, 2),
                                          jnp.asarray(lens_np), self.kernel)
        # prob arrives in bf16 (halves the D2H copy); upcast on host.
        prob_ct = np.asarray(jax.block_until_ready(prob_ct)).astype(np.float32)
        score = np.asarray(score)                                 # (B, 1, T) f32
        bdy_lst = []
        for i in range(fr_logit.shape[0]):
            t = int(lens_np[i])
            t_len = len(transcript[i])
            window_len = int(t / t_len * self.win_scale)
            bdy_score = np.array(score[i, 0, :t], dtype=np.float64)   # writable copy
            bdy_score[0] = -np.inf
            prob_np = np.array(prob_ct[i, :, :t].T, dtype=np.float32)  # (t, C)
            bdy_pts = self.find_bdy_pts_with_cls_transition(
                bdy_score, t_len - 1, window_len, prob_np, transcript[i])
            bdy_lst.append(bdy_pts)
        return bdy_lst


class LossFnPallas:
    def __init__(self, num_cls, bg_cls, args):
        self.alpha = args.alpha
        self.beta = args.beta
        self.gamma = args.gamma
        self.num_cls = num_cls
        self.bg_cls = bg_cls
        self.bdydet = BoundaryDetectorPallas(args.bdy_kernel, args.bdy_scale, args)
        self.warm_epc = args.warm_epc
        self.T = args.cts_temp
        self.args = args

    def forward(self, epoch, tok_logit, fr_logit, mask, transcript,
                vid_multi_hot, feat, name):
        tok_logit = jnp.asarray(tok_logit)
        fr_logit = jnp.asarray(fr_logit)
        feat = jnp.asarray(feat)
        mask_np = np.asarray(mask).astype(bool)
        tok_loss = self.token_cls_loss(tok_logit, vid_multi_hot)
        if epoch < self.warm_epc:
            return {'total': tok_loss, 'tok_loss': tok_loss,
                    'fr_loss': 0.0, 'glc_loss': 0.0}
        bdy_lst = self.bdydet.forward(fr_logit, mask_np, transcript)
        pse_la = self.generate_pseudo_label(bdy_lst, mask_np, transcript)
        fr_loss = self.fr_cls_loss(fr_logit, mask_np, pse_la)
        glc_loss = self.contrast_loss(feat, mask_np, pse_la)
        total = self.alpha * tok_loss + self.beta * fr_loss + self.gamma * glc_loss
        return {'total': total, 'tok_loss': tok_loss,
                'fr_loss': fr_loss, 'glc_loss': glc_loss}

    def token_cls_loss(self, tok_logit, vid_multi_hot):
        # TODO(synk): tiny elementwise mean -> plain jnp per perf review (a
        # grid=(1,) pallas_call was pure launch + DMA overhead).  Matches
        # F.binary_cross_entropy(sigmoid(x), y) except its -100 log clamp
        # (differs only for |x| >~ 100).
        x = tok_logit.astype(jnp.float32)
        y = jnp.asarray(vid_multi_hot, dtype=jnp.float32)
        bce = jnp.maximum(x, 0.0) - x * y + jnp.log1p(jnp.exp(-jnp.abs(x)))
        return jnp.mean(bce)

    def generate_pseudo_label(self, bdy_lst, mask_np, transcript):
        b, max_t = mask_np.shape
        plas = []
        for i in range(b):
            bdy = bdy_lst[i]
            tr = transcript[i]
            v = np.full((max_t,), -100, dtype=np.int64)
            for j in range(len(tr)):
                if j == 0:
                    start, end = 0, int(bdy[j])
                elif j == len(tr) - 1:
                    start, end = int(bdy[j - 1]), int(mask_np[i].sum())
                else:
                    start, end = int(bdy[j - 1]), int(bdy[j])
                v[start:end] = tr[j]
            plas.append(v)
        return np.stack(plas, axis=0)

    def fr_cls_loss(self, fr_logit, mask_np, pse_la):
        # TODO(synk): args.bgw < 1.0 weighted-CE branch not needed (bgw == 1.0 here).
        b, t, c = fr_logit.shape
        n = b * t
        tile = _pick_ce_tile(n)
        n_pad = ((n + 2 * tile - 1) // (2 * tile)) * (2 * tile)
        n_half = (n_pad // tile) // 2
        logits = jnp.reshape(fr_logit, (n, c)).astype(jnp.float32)
        if n_pad != n:
            logits = jnp.pad(logits, ((0, n_pad - n), (0, 0)))
        labels = np.full((n_pad,), -100, np.int32)
        labels[:n] = pse_la.reshape(n).astype(np.int32)
        maskf = np.zeros((n_pad,), np.float32)
        maskf[:n] = mask_np.reshape(n).astype(np.float32)
        return frame_ce_pallas(logits,
                               jnp.asarray(labels).reshape(n_pad, 1),
                               jnp.asarray(maskf).reshape(n_pad, 1),
                               tile, n_half)

    def contrast_loss(self, feat, mask_np, pse_la):
        # Batched pallas_call; per-video unique labels padded to num_cls rows with
        # a row-valid mask; the T axis is tiled and accumulated on-device.
        b, t = mask_np.shape
        L = self.num_cls
        tile_t = 256                               # lane-dim tile (multiple of 128)
        t_pad = ((t + tile_t - 1) // tile_t) * tile_t
        seg1h = np.zeros((b, L, t_pad), np.float32)
        lab1h = np.zeros((b, L, self.num_cls), np.float32)
        rowvalid = np.zeros((b, L, 1), np.float32)
        for i in range(b):
            valid = mask_np[i]
            vals = pse_la[i][valid]
            labels = np.unique(vals[vals != -100])
            for li, la in enumerate(labels):
                sel = valid & (pse_la[i] == la)
                seg1h[i, li, :t] = sel.astype(np.float32)
                lab1h[i, li, int(la)] = 1.0
                rowvalid[i, li, 0] = 1.0
        fr = feat[:, self.num_cls:, :].astype(jnp.bfloat16)      # bf16 HBM stream
        if t_pad != t:
            fr = jnp.pad(fr, ((0, 0), (0, t_pad - t), (0, 0)))
        tok = feat[:, :self.num_cls, :].astype(jnp.float32)
        per_vid = contrast_pallas(fr,
                                  jnp.asarray(seg1h, dtype=jnp.bfloat16),
                                  tok, jnp.asarray(lab1h), jnp.asarray(rowvalid),
                                  self.T, tile_t)
        return jnp.mean(per_vid)


# --------------------------------- driver -----------------------------------

if __name__ == "__main__":
    B, T, C, D = 2, 64, 8, 16
    key = jax.random.PRNGKey(0)
    k1, k2, k3 = jax.random.split(key, 3)
    tok_logit = jax.random.normal(k1, (B, C), jnp.float32)
    fr_logit = jax.random.normal(k2, (B, T, C), jnp.float32)
    feat = jax.random.normal(k3, (B, C + T, D), jnp.float32)

    lens = [56, 48]
    mask = np.zeros((B, T), dtype=bool)
    for i, l in enumerate(lens):
        mask[i, :l] = True
    transcript = [[1, 3, 5], [2, 4]]
    vid_multi_hot = np.zeros((B, C), np.float32)
    for i, tr in enumerate(transcript):
        vid_multi_hot[i, tr] = 1.0
    name = ['vid0', 'vid1']

    args = Args()
    lossfn = LossFnPallas(num_cls=C, bg_cls=0, args=args)
    out = lossfn.forward(1, tok_logit, fr_logit, mask, transcript,
                         vid_multi_hot, feat, name)
    total = jax.block_until_ready(out['total'])
    assert np.isfinite(float(total))
    assert np.isfinite(float(out['tok_loss']))
    assert np.isfinite(float(out['fr_loss']))
    assert np.isfinite(float(out['glc_loss']))
    print("KERNEL_OK")
</pallas_src>

<mosaic_0001>
module attributes {stable_mosaic.version = 11 : i64} {
  func.func @_bdy_kernel(%arg0: i32, %arg1: memref<2xi32, #tpu.memory_space<smem>>, %arg2: memref<1x8x64xf32, #tpu.memory_space<vmem>>, %arg3: memref<1x8x64xbf16, #tpu.memory_space<vmem>>, %arg4: memref<1x1x64xf32, #tpu.memory_space<vmem>>) attributes {dimension_semantics = [#tpu.dimension_semantics<parallel>], iteration_bounds = array<i64: 2>, scalar_prefetch = 1 : i64, scratch_operands = 0 : i64, tpu.core_type = #tpu.core_type<tc>, window_params = [{transform_indices = @transform_0, window_bounds = array<i64: 1, 8, 64>}, {transform_indices = @transform_1, window_bounds = array<i64: 1, 8, 64>}, {transform_indices = @transform_2, window_bounds = array<i64: 1, 1, 64>}]} {
    %0 = arith.index_cast %arg0 : i32 to index
    %1 = memref.load %arg1[%0] : memref<2xi32, #tpu.memory_space<smem>>
    %c0 = arith.constant 0 : index
    %c0_0 = arith.constant 0 : index
    %c0_1 = arith.constant 0 : index
    %2 = vector.load %arg2[%c0, %c0_0, %c0_1] : memref<1x8x64xf32, #tpu.memory_space<vmem>>, vector<1x8x64xf32>
    %3 = vector.shape_cast %2 : vector<1x8x64xf32> to vector<8x64xf32>
    %cst = arith.constant dense<0xFF800000> : vector<64xf32>
    %4 = vector.multi_reduction <maximumf>, %3, %cst [0] : vector<8x64xf32> to vector<64xf32>
    %5 = vector.shape_cast %4 : vector<64xf32> to vector<1x64xf32>
    %6 = vector.broadcast %5 : vector<1x64xf32> to vector<8x64xf32>
    %7 = arith.subf %3, %6 : vector<8x64xf32>
    %8 = math.exp %7 : vector<8x64xf32>
    %cst_2 = arith.constant dense<0.000000e+00> : vector<64xf32>
    %9 = vector.multi_reduction <add>, %8, %cst_2 [0] : vector<8x64xf32> to vector<64xf32>
    %10 = vector.shape_cast %9 : vector<64xf32> to vector<1x64xf32>
    %cst_3 = arith.constant 1.000000e+00 : f32
    %11 = vector.broadcast %cst_3 : f32 to vector<1x64xf32>
    %12 = arith.divf %11, %10 : vector<1x64xf32>
    %13 = vector.broadcast %12 : vector<1x64xf32> to vector<8x64xf32>
    %14 = arith.mulf %8, %13 : vector<8x64xf32>
    %15 = vector.broadcast %5 : vector<1x64xf32> to vector<8x64xf32>
    %16 = arith.subf %3, %15 : vector<8x64xf32>
    %17 = math.log %10 : vector<1x64xf32>
    %18 = vector.broadcast %17 : vector<1x64xf32> to vector<8x64xf32>
    %19 = arith.subf %16, %18 : vector<8x64xf32>
    %20 = tpu.iota {dimensions = array<i32: 1>} : vector<8x64xi32>
    %21 = vector.broadcast %1 : i32 to vector<8x64xi32>
    %22 = arith.cmpi slt, %20, %21 : vector<8x64xi32>
    %cst_4 = arith.constant 0.000000e+00 : f32
    %23 = vector.broadcast %cst_4 : f32 to vector<8x64xf32>
    %24 = arith.select %22, %14, %23 : vector<8x64xi1>, vector<8x64xf32>
    %cst_5 = arith.constant 0.000000e+00 : f32
    %25 = vector.broadcast %cst_5 : f32 to vector<8x64xf32>
    %26 = arith.select %22, %19, %25 : vector<8x64xi1>, vector<8x64xf32>
    %27 = arith.truncf %24 : vector<8x64xf32> to vector<8x64xbf16>
    %c0_6 = arith.constant 0 : index
    %c0_7 = arith.constant 0 : index
    %c0_8 = arith.constant 0 : index
    %28 = vector.load %arg3[%c0_6, %c0_7, %c0_8] : memref<1x8x64xbf16, #tpu.memory_space<vmem>>, vector<1x8x64xbf16>
    %29 = vector.shape_cast %28 : vector<1x8x64xbf16> to vector<8x64xbf16>
    %30 = vector.shape_cast %27 : vector<8x64xbf16> to vector<1x8x64xbf16>
    tpu.vector_store %arg3[%c0_6, %c0_7, %c0_8], %30 {strides = array<i32>} : memref<1x8x64xbf16, #tpu.memory_space<vmem>>, vector<1x8x64xbf16>,
    %cst_9 = arith.constant 0.000000e+00 : f32
    %31 = vector.broadcast %cst_9 : f32 to vector<8x2xf32>
    %32 = tpu.concatenate %31, %24, %31 in 1 : vector<8x2xf32>, vector<8x64xf32>, vector<8x2xf32> -> vector<8x68xf32>
    %33 = tpu.concatenate %31, %26, %31 in 1 : vector<8x2xf32>, vector<8x64xf32>, vector<8x2xf32> -> vector<8x68xf32>
    %34 = vector.extract_strided_slice %32 {offsets = [0, 0], sizes = [8, 64], strides = [1, 1]} : vector<8x68xf32> to vector<8x64xf32>
    %35 = vector.extract_strided_slice %32 {offsets = [0, 1], sizes = [8, 64], strides = [1, 1]} : vector<8x68xf32> to vector<8x64xf32>
    %36 = vector.extract_strided_slice %32 {offsets = [0, 2], sizes = [8, 64], strides = [1, 1]} : vector<8x68xf32> to vector<8x64xf32>
    %37 = vector.extract_strided_slice %32 {offsets = [0, 3], sizes = [8, 64], strides = [1, 1]} : vector<8x68xf32> to vector<8x64xf32>
    %38 = vector.extract_strided_slice %32 {offsets = [0, 4], sizes = [8, 64], strides = [1, 1]} : vector<8x68xf32> to vector<8x64xf32>
    %39 = vector.extract_strided_slice %33 {offsets = [0, 0], sizes = [8, 64], strides = [1, 1]} : vector<8x68xf32> to vector<8x64xf32>
    %40 = vector.extract_strided_slice %33 {offsets = [0, 1], sizes = [8, 64], strides = [1, 1]} : vector<8x68xf32> to vector<8x64xf32>
    %41 = vector.extract_strided_slice %33 {offsets = [0, 2], sizes = [8, 64], strides = [1, 1]} : vector<8x68xf32> to vector<8x64xf32>
    %42 = vector.extract_strided_slice %33 {offsets = [0, 3], sizes = [8, 64], strides = [1, 1]} : vector<8x68xf32> to vector<8x64xf32>
    %43 = vector.extract_strided_slice %33 {offsets = [0, 4], sizes = [8, 64], strides = [1, 1]} : vector<8x68xf32> to vector<8x64xf32>
    %44 = vector.extract_strided_slice %32 {offsets = [0, 0], sizes = [8, 67], strides = [1, 1]} : vector<8x68xf32> to vector<8x67xf32>
    %45 = vector.extract_strided_slice %32 {offsets = [0, 1], sizes = [8, 67], strides = [1, 1]} : vector<8x68xf32> to vector<8x67xf32>
    %46 = arith.addf %44, %45 : vector<8x67xf32>
    %cst_10 = arith.constant 5.000000e-01 : f32
    %47 = vector.broadcast %cst_10 : f32 to vector<8x67xf32>
    %48 = arith.mulf %47, %46 : vector<8x67xf32>
    %cst_11 = arith.constant 1.000000e-32 : f32
    %49 = vector.broadcast %cst_11 : f32 to vector<8x67xf32>
    %50 = arith.addf %48, %49 : vector<8x67xf32>
    %51 = math.log %50 : vector<8x67xf32>
    %52 = vector.extract_strided_slice %32 {offsets = [0, 0], sizes = [8, 66], strides = [1, 1]} : vector<8x68xf32> to vector<8x66xf32>
    %53 = vector.extract_strided_slice %32 {offsets = [0, 2], sizes = [8, 66], strides = [1, 1]} : vector<8x68xf32> to vector<8x66xf32>
    %54 = arith.addf %52, %53 : vector<8x66xf32>
    %cst_12 = arith.constant 5.000000e-01 : f32
    %55 = vector.broadcast %cst_12 : f32 to vector<8x66xf32>
    %56 = arith.mulf %55, %54 : vector<8x66xf32>
    %cst_13 = arith.constant 1.000000e-32 : f32
    %57 = vector.broadcast %cst_13 : f32 to vector<8x66xf32>
    %58 = arith.addf %56, %57 : vector<8x66xf32>
    %59 = math.log %58 : vector<8x66xf32>
    %60 = vector.extract_strided_slice %32 {offsets = [0, 0], sizes = [8, 65], strides = [1, 1]} : vector<8x68xf32> to vector<8x65xf32>
    %61 = vector.extract_strided_slice %32 {offsets = [0, 3], sizes = [8, 65], strides = [1, 1]} : vector<8x68xf32> to vector<8x65xf32>
    %62 = arith.addf %60, %61 : vector<8x65xf32>
    %cst_14 = arith.constant 5.000000e-01 : f32
    %63 = vector.broadcast %cst_14 : f32 to vector<8x65xf32>
    %64 = arith.mulf %63, %62 : vector<8x65xf32>
    %cst_15 = arith.constant 1.000000e-32 : f32
    %65 = vector.broadcast %cst_15 : f32 to vector<8x65xf32>
    %66 = arith.addf %64, %65 : vector<8x65xf32>
    %67 = math.log %66 : vector<8x65xf32>
    %68 = vector.extract_strided_slice %32 {offsets = [0, 0], sizes = [8, 64], strides = [1, 1]} : vector<8x68xf32> to vector<8x64xf32>
    %69 = vector.extract_strided_slice %32 {offsets = [0, 4], sizes = [8, 64], strides = [1, 1]} : vector<8x68xf32> to vector<8x64xf32>
    %70 = arith.addf %68, %69 : vector<8x64xf32>
    %cst_16 = arith.constant 5.000000e-01 : f32
    %71 = vector.broadcast %cst_16 : f32 to vector<8x64xf32>
    %72 = arith.mulf %71, %70 : vector<8x64xf32>
    %cst_17 = arith.constant 1.000000e-32 : f32
    %73 = vector.broadcast %cst_17 : f32 to vector<8x64xf32>
    %74 = arith.addf %72, %73 : vector<8x64xf32>
    %75 = math.log %74 : vector<8x64xf32>
    %cst_18 = arith.constant 0.000000e+00 : f32
    %76 = vector.broadcast %cst_18 : f32 to vector<8x64xf32>
    %77 = vector.extract_strided_slice %51 {offsets = [0, 0], sizes = [8, 64], strides = [1, 1]} : vector<8x67xf32> to vector<8x64xf32>
    %78 = arith.subf %39, %77 : vector<8x64xf32>
    %79 = arith.mulf %34, %78 : vector<8x64xf32>
    %80 = arith.subf %40, %77 : vector<8x64xf32>
    %81 = arith.mulf %35, %80 : vector<8x64xf32>
    %82 = arith.addf %79, %81 : vector<8x64xf32>
    %cst_19 = arith.constant 2.000000e+00 : f32
    %83 = vector.broadcast %cst_19 : f32 to vector<8x64xf32>
    %84 = arith.mulf %83, %82 : vector<8x64xf32>
    %85 = arith.addf %76, %84 : vector<8x64xf32>
    %86 = vector.extract_strided_slice %59 {offsets = [0, 0], sizes = [8, 64], strides = [1, 1]} : vector<8x66xf32> to vector<8x64xf32>
    %87 = arith.subf %39, %86 : vector<8x64xf32>
    %88 = arith.mulf %34, %87 : vector<8x64xf32>
    %89 = arith.subf %41, %86 : vector<8x64xf32>
    %90 = arith.mulf %36, %89 : vector<8x64xf32>
    %91 = arith.addf %88, %90 : vector<8x64xf32>
    %cst_20 = arith.constant -2.000000e+00 : f32
    %92 = vector.broadcast %cst_20 : f32 to vector<8x64xf32>
    %93 = arith.mulf %92, %91 : vector<8x64xf32>
    %94 = arith.addf %85, %93 : vector<8x64xf32>
    %95 = vector.extract_strided_slice %67 {offsets = [0, 0], sizes = [8, 64], strides = [1, 1]} : vector<8x65xf32> to vector<8x64xf32>
    %96 = arith.subf %39, %95 : vector<8x64xf32>
    %97 = arith.mulf %34, %96 : vector<8x64xf32>
    %98 = arith.subf %42, %95 : vector<8x64xf32>
    %99 = arith.mulf %37, %98 : vector<8x64xf32>
    %100 = arith.addf %97, %99 : vector<8x64xf32>
    %cst_21 = arith.constant -2.000000e+00 : f32
    %101 = vector.broadcast %cst_21 : f32 to vector<8x64xf32>
    %102 = arith.mulf %101, %100 : vector<8x64xf32>
    %103 = arith.addf %94, %102 : vector<8x64xf32>
    %104 = arith.subf %39, %75 : vector<8x64xf32>
    %105 = arith.mulf %34, %104 : vector<8x64xf32>
    %106 = arith.subf %43, %75 : vector<8x64xf32>
    %107 = arith.mulf %38, %106 : vector<8x64xf32>
    %108 = arith.addf %105, %107 : vector<8x64xf32>
    %cst_22 = arith.constant -2.000000e+00 : f32
    %109 = vector.broadcast %cst_22 : f32 to vector<8x64xf32>
    %110 = arith.mulf %109, %108 : vector<8x64xf32>
    %111 = arith.addf %103, %110 : vector<8x64xf32>
    %112 = vector.extract_strided_slice %51 {offsets = [0, 1], sizes = [8, 64], strides = [1, 1]} : vector<8x67xf32> to vector<8x64xf32>
    %113 = arith.subf %40, %112 : vector<8x64xf32>
    %114 = arith.mulf %35, %113 : vector<8x64xf32>
    %115 = arith.subf %41, %112 : vector<8x64xf32>
    %116 = arith.mulf %36, %115 : vector<8x64xf32>
    %117 = arith.addf %114, %116 : vector<8x64xf32>
    %cst_23 = arith.constant -2.000000e+00 : f32
    %118 = vector.broadcast %cst_23 : f32 to vector<8x64xf32>
    %119 = arith.mulf %118, %117 : vector<8x64xf32>
    %120 = arith.addf %111, %119 : vector<8x64xf32>
    %121 = vector.extract_strided_slice %59 {offsets = [0, 1], sizes = [8, 64], strides = [1, 1]} : vector<8x66xf32> to vector<8x64xf32>
    %122 = arith.subf %40, %121 : vector<8x64xf32>
    %123 = arith.mulf %35, %122 : vector<8x64xf32>
    %124 = arith.subf %42, %121 : vector<8x64xf32>
    %125 = arith.mulf %37, %124 : vector<8x64xf32>
    %126 = arith.addf %123, %125 : vector<8x64xf32>
    %cst_24 = arith.constant -2.000000e+00 : f32
    %127 = vector.broadcast %cst_24 : f32 to vector<8x64xf32>
    %128 = arith.mulf %127, %126 : vector<8x64xf32>
    %129 = arith.addf %120, %128 : vector<8x64xf32>
    %130 = vector.extract_strided_slice %67 {offsets = [0, 1], sizes = [8, 64], strides = [1, 1]} : vector<8x65xf32> to vector<8x64xf32>
    %131 = arith.subf %40, %130 : vector<8x64xf32>
    %132 = arith.mulf %35, %131 : vector<8x64xf32>
    %133 = arith.subf %43, %130 : vector<8x64xf32>
    %134 = arith.mulf %38, %133 : vector<8x64xf32>
    %135 = arith.addf %132, %134 : vector<8x64xf32>
    %cst_25 = arith.constant -2.000000e+00 : f32
    %136 = vector.broadcast %cst_25 : f32 to vector<8x64xf32>
    %137 = arith.mulf %136, %135 : vector<8x64xf32>
    %138 = arith.addf %129, %137 : vector<8x64xf32>
    %139 = vector.extract_strided_slice %51 {offsets = [0, 2], sizes = [8, 64], strides = [1, 1]} : vector<8x67xf32> to vector<8x64xf32>
    %140 = arith.subf %41, %139 : vector<8x64xf32>
    %141 = arith.mulf %36, %140 : vector<8x64xf32>
    %142 = arith.subf %42, %139 : vector<8x64xf32>
    %143 = arith.mulf %37, %142 : vector<8x64xf32>
    %144 = arith.addf %141, %143 : vector<8x64xf32>
    %cst_26 = arith.constant 2.000000e+00 : f32
    %145 = vector.broadcast %cst_26 : f32 to vector<8x64xf32>
    %146 = arith.mulf %145, %144 : vector<8x64xf32>
    %147 = arith.addf %138, %146 : vector<8x64xf32>
    %148 = vector.extract_strided_slice %59 {offsets = [0, 2], sizes = [8, 64], strides = [1, 1]} : vector<8x66xf32> to vector<8x64xf32>
    %149 = arith.subf %41, %148 : vector<8x64xf32>
    %150 = arith.mulf %36, %149 : vector<8x64xf32>
    %151 = arith.subf %43, %148 : vector<8x64xf32>
    %152 = arith.mulf %38, %151 : vector<8x64xf32>
    %153 = arith.addf %150, %152 : vector<8x64xf32>
    %cst_27 = arith.constant 2.000000e+00 : f32
    %154 = vector.broadcast %cst_27 : f32 to vector<8x64xf32>
    %155 = arith.mulf %154, %153 : vector<8x64xf32>
    %156 = arith.addf %147, %155 : vector<8x64xf32>
    %157 = vector.extract_strided_slice %51 {offsets = [0, 3], sizes = [8, 64], strides = [1, 1]} : vector<8x67xf32> to vector<8x64xf32>
    %158 = arith.subf %42, %157 : vector<8x64xf32>
    %159 = arith.mulf %37, %158 : vector<8x64xf32>
    %160 = arith.subf %43, %157 : vector<8x64xf32>
    %161 = arith.mulf %38, %160 : vector<8x64xf32>
    %162 = arith.addf %159, %161 : vector<8x64xf32>
    %cst_28 = arith.constant 2.000000e+00 : f32
    %163 = vector.broadcast %cst_28 : f32 to vector<8x64xf32>
    %164 = arith.mulf %163, %162 : vector<8x64xf32>
    %165 = arith.addf %156, %164 : vector<8x64xf32>
    %cst_29 = arith.constant dense<0.000000e+00> : vector<64xf32>
    %166 = vector.multi_reduction <add>, %165, %cst_29 [0] : vector<8x64xf32> to vector<64xf32>
    %167 = vector.shape_cast %166 : vector<64xf32> to vector<1x64xf32>
    %cst_30 = arith.constant 1.44269502 : f32
    %168 = vector.broadcast %cst_30 : f32 to vector<1x64xf32>
    %169 = arith.mulf %167, %168 : vector<1x64xf32>
    %cst_31 = arith.constant 0.000000e+00 : f32
    %170 = vector.broadcast %cst_31 : f32 to vector<1x64xf32>
    %171 = arith.subf %170, %169 : vector<1x64xf32>
    %cst_32 = arith.constant 4.000000e-02 : f32
    %172 = vector.broadcast %cst_32 : f32 to vector<1x64xf32>
    %173 = arith.mulf %171, %172 : vector<1x64xf32>
    %c0_33 = arith.constant 0 : index
    %c0_34 = arith.constant 0 : index
    %c0_35 = arith.constant 0 : index
    %174 = vector.load %arg4[%c0_33, %c0_34, %c0_35] : memref<1x1x64xf32, #tpu.memory_space<vmem>>, vector<1x1x64xf32>
    %175 = vector.shape_cast %174 : vector<1x1x64xf32> to vector<1x64xf32>
    %176 = vector.shape_cast %173 : vector<1x64xf32> to vector<1x1x64xf32>
    tpu.vector_store %arg4[%c0_33, %c0_34, %c0_35], %176 {strides = array<i32>} : memref<1x1x64xf32, #tpu.memory_space<vmem>>, vector<1x1x64xf32>,
    return
  }
  func.func @transform_0(%arg0: i32, %arg1: memref<2xi32, #tpu.memory_space<smem>>) -> (i32, i32, i32) {
    %c0_i32 = arith.constant 0 : i32
    %c0_i32_0 = arith.constant 0 : i32
    %c0_i32_1 = arith.constant 0 : i32
    return %arg0, %c0_i32, %c0_i32_0 : i32, i32, i32
  }
  func.func @transform_1(%arg0: i32, %arg1: memref<2xi32, #tpu.memory_space<smem>>) -> (i32, i32, i32) {
    %c0_i32 = arith.constant 0 : i32
    %c0_i32_0 = arith.constant 0 : i32
    %c0_i32_1 = arith.constant 0 : i32
    return %arg0, %c0_i32, %c0_i32_0 : i32, i32, i32
  }
  func.func @transform_2(%arg0: i32, %arg1: memref<2xi32, #tpu.memory_space<smem>>) -> (i32, i32, i32) {
    %c0_i32 = arith.constant 0 : i32
    %c0_i32_0 = arith.constant 0 : i32
    %c0_i32_1 = arith.constant 0 : i32
    return %arg0, %c0_i32, %c0_i32_0 : i32, i32, i32
  }
}

</mosaic_0001>

<bundles_post_ra>
// kernel: tpu_custom_call.1
= control target key start
LH: loop header
LB: loop body
LE: loop exit
PB: predicated region body
PF: predicated region fallthrough
CT: control target
= control target key end

     0   :  { %s996_s0 = inlined_call_operand.hbm [shape: s32[2], index: 0, kind: input, shape index: {}]   ;;  %s997_s1 = inlined_call_operand.hbm [shape: f32[2,8,64], index: 1, kind: input, shape index: {}]   ;;  %s998_s2 = inlined_call_operand.hbm [shape: bf16[2,8,64], index: 2, kind: output, shape index: {0}]   ;;  %s999_s3 = inlined_call_operand.hbm [shape: f32[2,1,64], index: 3, kind: output, shape index: {1}]  }
   0x1   :  { %s575_s14 = scalar_lea.hbm %s996_s0, 16 }
   0x2   :  { %p576_p0 = scmp.ne.s32.totalorder %s996_s0, %s575_s14  ;;  %p579_p1 = scmp.lt.u32.totalorder %s575_s14, %s996_s0 }
   0x4   :  { %p581_p2 = pnand %p579_p1, %p576_p0 }
   0x6   :  { %584 = shalt.err (!%p581_p2)  }
   0x7   :  { %s717_s19 = smov [#allocation3]  }
   0x8   :  { %10 = dma.hbm_to_smem %s996_s0, 16, %s717_s19, [#allocation2] }
   0x9   :  { %687 = dma.done.wait [#allocation2], 16 }
   0xa   :  { %688 = vsyncadd [#allocation2], 4294967280 }
   0xb   :  { %12 = sfence }
   0xc   :  { %13 = vsyncpa [#allocation5], 0 }
   0xd   :  { %15 = vsyncpa [#allocation5 + $0x1], 0 }
   0xe   :  { %16 = vsyncpa [#allocation6], 0 }
   0xf   :  { %18 = vsyncpa [#allocation6 + $0x1], 0 }
  0x10   :  { %19 = vsyncpa [#allocation9], 0 }
  0x11   :  { %21 = vsyncpa [#allocation9 + $0x1], 0  ;;  %s761_s22 = smov 0   ;;  %s763_s23 = smov 0  }
  0x12   :  { %s765_s24 = smov 0   ;;  %s767_s25 = smov 0  }
  0x13 LB: > { %s782_s0 = sadd.s32 4294967295, %s715_s25   ;;  %s488_s26 = sadd.s32 4294967294, %s715_s25   ;;  %s715_s25 = sphi %s767_s25, %s1014_s25   ;;  %s711_s24 = sphi %s765_s24, %s1013_s24   ;;  %s707_s23 = sphi %s763_s23, %s1012_s23   ;;  %s703_s22 = sphi %s761_s22, %s1011_s22  }
  0x14   : > { %s786_s27 = sadd.s32 1, %s715_s25   ;;  %s34_s28 = sadd.s32 1, %s711_s24 }
  0x15   : > { %s31_s29 = ssub.s32 %s715_s25, %s786_s27  ;;  %p41_p3 = scmp.ne.s32.totalorder %s711_s24, %s707_s23 }
  0x16   : > { %p32_p4 = scmp.eq.s32.totalorder %s31_s29, 0  ;;  %p42_p5 = scmp.eq.s32.totalorder %s715_s25, 0 }
  0x17   : > { %p47_p6 = scmp.ne.s32.totalorder %s707_s23, %s703_s22  ;;  %p48_p7 = scmp.eq.s32.totalorder %s782_s0, 0 }
  0x18   : > { %s798_s30 = scalar_select %p32_p4, %s711_s24, %s34_s28  }
  0x19   : > { %p800_p8 = por %p42_p5, %p41_p3  ;;  %p804_p9 = por %p48_p7, %p47_p6 }
  0x1a   : > { %p71_p10 = scmp.eq.s32.totalorder %s782_s0, 1  ;;  %p77_p11 = scmp.eq.s32.totalorder %s488_s26, 1 }
  0x1b   : > { %p518_p13 = scmp.lt.s32.totalorder %s715_s25, 2  ;;  %s123_s8 = sand.u32 1, %s711_s24  }
  0x1c   : > { %p811_p0 = por %p71_p10, %p41_p3  ;;  %p815_p1 = por %p77_p11, %p47_p6 }
  0x1d   : > { %s492_s9 = sshll.u32 %s715_s25, 7  ;;  %s491_s10 = sshll.u32 %s123_s8, 3 }
  0x1e   : > { %s1003_s6 = scalar_select %p811_p0, 1, 0 }
  0x1f   : > { %s1004_s7 = scalar_select %p815_p1, 1, 0 }
  0x20   : > { %s824_s13 = scalar_lea.hbm %s997_s1, %s492_s9  ;;  %s127_s14 = scalar_lea.vmem [#allocation4], %s491_s10 }
  0x21   : > { %s134_s15 = sshll.u32 %s127_s14, 4  ;;  %p828_p2 = pnand %p518_p13, %p800_p8  ;;  %s832_s15 = int_to_ptr.vmem [resolvable:$true] %s134_s15 }
  0x22   : > { %s124_s17 = scalar_lea.sflag [#allocation5], %s123_s8  ;;  %s585_s18 = scalar_lea.hbm %s824_s13, 128 }
  0x23   : > { %p586_p5 = scmp.ne.s32.totalorder %s824_s13, %s585_s18  ;;  %p587_p6 = pneg %p828_p2 }
  0x24   : > { %s590_s21 = scalar_lea.hbm %s997_s1, 256  ;;  %p591_p8 = scmp.lt.u32.totalorder %s824_s13, %s997_s1 }
  0x25   : > { %p588_p7 = pnand %p587_p6, %p586_p5  ;;  %p592_p11 = scmp.lt.u32.totalorder %s590_s21, %s585_s18 }
  0x26   : > { %p594_p12 = scmp.lt.u32.totalorder %s585_s18, %s824_s13 }
  0x27   : > { %p589_p10 = pneg %p588_p7  ;;  %p593_p13 = por %p592_p11, %p591_p8 }
  0x29   : > { %p595_p3 = por %p594_p12, %p593_p13 }
  0x2b   : > { %p596_p4 = pnand %p595_p3, %p589_p10 }
  0x2d   : > { %599 = shalt.err (!%p596_p4)
}
  0x2e   : > { %s600_s29 = scalar_lea.vmem %s832_s15, 128  ;;  %s718_s4 = smov [#allocation4]  }
  0x2f   : > { %p601_p5 = scmp.ne.s32.totalorder %s832_s15, %s600_s29  ;;  %s605_s8 = sshll.u32 %s718_s4, 4  ;;  %s606_s8 = int_to_ptr.vmem [resolvable:$false] %s605_s8 }
  0x30   : > { %s607_s9 = scalar_lea.vmem %s606_s8, 256  ;;  %p608_p0 = scmp.lt.s32.totalorder %s832_s15, %s606_s8 }
  0x31   : > { %p603_p7 = pnand %p601_p5, %p587_p6  ;;  %p609_p8 = scmp.lt.s32.totalorder %s607_s9, %s600_s29 }
  0x33   : > { %p604_p1 = pneg %p603_p7  ;;  %p610_p11 = por %p609_p8, %p608_p0 }
  0x35   : > { %p611_p12 = pnand %p610_p11, %p604_p1 }
  0x37   : > { %614 = shalt.err (!%p611_p12)
}
  0x38   : > { %510 = dma.hbm_to_vmem [thread:$0]  (!%p828_p2), %s824_s13, 128, %s832_s15, %s124_s17  }
  0x39   : > { %p1006_p3 = scmp.lt.s32.totalorder %s715_s25, 3  ;;  %p1007_p4 = scmp.ge.s32.totalorder %s715_s25, 1 }
  0x3b   : > { %p140_p6 = pnand %p1007_p4, %p1006_p3 }
  0x3c   : > { %s866_s10 = sand.u32 (!%p140_p6), 1, %s707_s23  }
  0x3d   : > { %143 = sbr.rel (%p140_p6) target bundleno = 775 (0x307), region = 24  ;;  %s494_s11 = sshll.u32 (!%p140_p6), %s866_s10, 3 }
  0x3e   : > { %s146_s12 = scalar_lea.sflag (!%p140_p6), [#allocation5], %s866_s10  ;;  %s149_s14 = scalar_lea.vmem (!%p140_p6), [#allocation4], %s494_s11 }
  0x44   : > { %690 = dma.done.wait (%p804_p9), %s146_s12, 128  }
  0x45   : > { %692 = vsyncadd (%p804_p9), %s146_s12, 4294967168  ;;  %vm176_vm0 = vcmask 523264   ;;  %v175_v0 = vld [vmem:[%s149_s14] sm:$0xff]  ;;  %s174_s5 = sld [smem:[#allocation3 + %s782_s0]]  ;;  %v200_v18 = vlaneseq  ;;  %s719_s13 = smov 2   ;;  %vm213_vm2 = vcmask 15360  }
  0x46   : > { %v177_v1 = vsel %vm176_vm0, %v175_v0, -inf  ;;  %vm215_vm3 = vcmask 539648   ;;  %s720_s15 = smov 126   ;;  %s721_s16 = smov 127   ;;  %vm207_vm4 = vcmask 519168  }
  0x47   : > { %v178_v2 = vrot.slane %v177_v1, 4  ;;  %v201_v19 = vand.u32 127, %v200_v18  ;;  %s722_s17 = smov 125   ;;  %s723_s18 = smov 124  }
  0x48   : > { %s724_s19 = smov 1   ;;  %s725_s20 = smov 3  }
  0x49   : > { %v179_v3 = vmax.f32 %v177_v1, %v178_v2  ;;  %s726_s21 = smov 4   ;;  %s495_s26 = sshll.u32 %s866_s10, 2 }
  0x4a   : > { %s167_s28 = scalar_lea.vmem [#allocation7], %s495_s26  ;;  %s497_s29 = sshll.u32 %s782_s0, 6 }
  0x4b   : > { %v180_v4 = vrot.slane %v179_v3, 2  ;;  %v202_v20 = vstv %s174_s5  ;;  %s377_s4 = sshll.u32 %s167_s28, 4  ;;  %s926_s11 = scalar_lea.hbm %s998_s2, %s497_s29  ;;  %s378_s4 = int_to_ptr.vmem [resolvable:$true] %s377_s4 }
  0x4c   : > { %vm203_vm1 = vcmp.lt.s32.totalorder %v201_v19, %v202_v20  ;;  %s360_s12 = scalar_lea.sflag [#allocation6], %s866_s10  ;;  %s615_s14 = scalar_lea.vmem %s378_s4, 64 }
  0x4d   : > { %v181_v5 = vmax.f32 %v179_v3, %v180_v4  ;;  %p616_p9 = scmp.ne.s32.totalorder %s378_s4, %s615_s14  ;;  %p1008_p0 = scmp.ne.s32.totalorder %s1003_s6, 0 }
  0x4e   : > { %s727_s5 = smov [#allocation7]  }
  0x4f   : > { %v182_v6 = vrot.slane %v181_v5, 1  ;;  %p617_p1 = pnand %p616_p9, %p1008_p0 }
  0x51   : > { %v183_v7 = vmax.f32 %v181_v5, %v182_v6  ;;  %p618_p2 = pneg %p617_p1 }
  0x53   : > { %v184_v8 = vsub.f32 %v175_v0, %v183_v7 }
  0x55   : > { %v185_v9 = vmul.f32 1.442695, %v184_v8 }
  0x57   : > { %561 = vpow2.f32 %v185_v9 }
  0x61   : > { %v562_v10 = vpop.eup %561 }
  0x62   : > { %v187_v11 = vsel %vm176_vm0, %v562_v10, 0.0 }
  0x63   : > { %v188_v12 = vrot.slane %v187_v11, 4 }
  0x65   : > { %v189_v13 = vadd.f32 %v188_v12, %v187_v11 }
  0x67   : > { %v190_v14 = vrot.slane %v189_v13, 2 }
  0x69   : > { %v191_v15 = vadd.f32 %v190_v14, %v189_v13 }
  0x6b   : > { %v192_v16 = vrot.slane %v191_v15, 1 }
  0x6d   : > { %v193_v17 = vadd.f32 %v192_v16, %v191_v15 }
  0x6f   : > { %563 = vrcp.f32 %v193_v17 }
  0x70   : > { %565 = vlog2.f32 %v193_v17 }
  0x79   : > { %v564_v21 = vpop.eup %563 }
  0x7a   : > { %v196_v22 = vmul.f32 %v564_v21, %v562_v10  ;;  %v566_v24 = vpop.eup %565 }
  0x7b   : > { %v198_v25 = vmul.f32 0.6931472, %v566_v24 }
  0x7c   : > { %v877_v23 = vsel %vm203_vm1, %v196_v22, 0.0 }
  0x7d   : > { %210 = vrot.lane.b32.xlu0 %v877_v23, %s719_s13  ;;  %v199_v26 = vsub.f32 %v184_v8, %v198_v25 }
  0x7f   : > { %v205_v27 = vsel %vm203_vm1, %v199_v26, 0.0 }
  0xef   : > { %v211_v28 = vpop.permute.xlu0 %210 }
  0xf0   : > { %v214_v29 = vsel %vm213_vm2, 0.0, %v211_v28 }
  0xf1   : > { %v883_v30 = vsel %vm215_vm3, %v214_v29, 0.0 }
  0xf2   : > { %232 = vrot.lane.b32.xlu1 %v883_v30, %s720_s15  ;;  %224 = vrot.lane.b32.xlu0 %v883_v30, %s721_s16 }
  0xf6   : > { %240 = vrot.lane.b32.xlu1 %v883_v30, %s722_s17  ;;  %248 = vrot.lane.b32.xlu0 %v883_v30, %s723_s18 }
  0xfa   : > { %218 = vrot.lane.b32.xlu1 %v205_v27, %s719_s13 }
 0x164   : > { %v233_v31 = vpop.permute.xlu1 %232  ;;  %v225_v32 = vpop.permute.xlu0 %224 }
 0x165   : > { %v235_v33 = vadd.f32 %v233_v31, %v883_v30  ;;  %v227_v34 = vadd.f32 %v225_v32, %v883_v30  ;;  %v206_v32 = vpack.c.bf16 %v877_v23, %v877_v23 }
 0x167   : > { %v236_v35 = vmul.f32 0.5, %v235_v33  ;;  %v228_v36 = vmul.f32 0.5, %v227_v34  ;;  %208 = vst.msk [vmem:[%s167_s28] sm:$0xf] %vm207_vm4, %v206_v32 }
 0x168   : > { %v241_v37 = vpop.permute.xlu1 %240  ;;  %v249_v38 = vpop.permute.xlu0 %248 }
 0x169   : > { %v237_v39 = vadd.f32 1e-32, %v236_v35  ;;  %v229_v40 = vadd.f32 1e-32, %v228_v36  ;;  %v243_v41 = vadd.f32 %v241_v37, %v883_v30  ;;  %v251_v42 = vadd.f32 %v249_v38, %v883_v30 }
 0x16b   : > { %567 = vlog2.f32 %v237_v39  ;;  %v244_v43 = vmul.f32 0.5, %v243_v41  ;;  %v252_v44 = vmul.f32 0.5, %v251_v42 }
 0x16c   : > { %569 = vlog2.f32 %v229_v40  ;;  %v219_v55 = vpop.permute.xlu1 %218 }
 0x16d   : > { %v245_v45 = vadd.f32 1e-32, %v244_v43  ;;  %v253_v46 = vadd.f32 1e-32, %v252_v44  ;;  %v221_v56 = vsel %vm213_vm2, 0.0, %v219_v55 }
 0x16e   : > { %v222_v57 = vsel %vm215_vm3, %v221_v56, 0.0 }
 0x16f   : > { %571 = vlog2.f32 %v245_v45 }
 0x170   : > { %573 = vlog2.f32 %v253_v46 }
 0x175   : > { %v568_v47 = vpop.eup %567 }
 0x176   : > { %v570_v48 = vpop.eup %569  ;;  %v239_v49 = vmul.f32 0.6931472, %v568_v47 }
 0x177   : > { %v231_v50 = vmul.f32 0.6931472, %v570_v48 }
 0x178   : > { %274 = vrot.lane.b32.xlu1 %v239_v49, %s719_s13  ;;  %v271_v6 = vsub.f32 %v222_v57, %v239_v49  ;;  %s619_s13 = sshll.u32 %s727_s5, 4  ;;  %s620_s13 = int_to_ptr.vmem [resolvable:$false] %s619_s13 }
 0x179   : > { %v572_v51 = vpop.eup %571  ;;  %259 = vrot.lane.b32.xlu0 %v231_v50, %s724_s19  ;;  %v256_v7 = vsub.f32 %v222_v57, %v231_v50  ;;  %p622_p10 = scmp.lt.s32.totalorder %s378_s4, %s620_s13 }
 0x17a   : > { %v574_v52 = vpop.eup %573  ;;  %v247_v53 = vmul.f32 0.6931472, %v572_v51  ;;  %v272_v8 = vmul.f32 %v271_v6, %v883_v30 }
 0x17b   : > { %v255_v54 = vmul.f32 0.6931472, %v574_v52  ;;  %v257_v10 = vmul.f32 %v256_v7, %v883_v30 }
 0x17c   : > { %v286_v12 = vsub.f32 %v222_v57, %v247_v53 }
 0x17d   : > { %289 = vrot.lane.b32.xlu0 %v247_v53, %s725_s20  ;;  %304 = vrot.lane.b32.xlu1 %v255_v54, %s726_s21  ;;  %v301_v11 = vsub.f32 %v222_v57, %v255_v54 }
 0x17e   : > { %v287_v20 = vmul.f32 %v286_v12, %v883_v30 }
 0x17f   : > { %v302_v19 = vmul.f32 %v301_v11, %v883_v30 }
 0x1ea   : > { %v275_v58 = vpop.permute.xlu1 %274 }
 0x1eb   : > { %v277_v59 = vsub.f32 %v222_v57, %v275_v58  ;;  %v260_v60 = vpop.permute.xlu0 %259 }
 0x1ec   : > { %v262_v61 = vsub.f32 %v222_v57, %v260_v60 }
 0x1ed   : > { %v278_v62 = vmul.f32 %v277_v59, %v883_v30 }
 0x1ee   : > { %v263_v63 = vmul.f32 %v262_v61, %v883_v30 }
 0x1ef   : > { %v305_v0 = vpop.permute.xlu1 %304  ;;  %v290_v1 = vpop.permute.xlu0 %289  ;;  %280 = vrot.lane.b32.xlu1 %v278_v62, %s720_s15 }
 0x1f0   : > { %v307_v2 = vsub.f32 %v222_v57, %v305_v0  ;;  %v292_v3 = vsub.f32 %v222_v57, %v290_v1  ;;  %265 = vrot.lane.b32.xlu0 %v263_v63, %s721_s16 }
 0x1f2   : > { %v308_v4 = vmul.f32 %v307_v2, %v883_v30  ;;  %v293_v5 = vmul.f32 %v292_v3, %v883_v30 }
 0x1f4   : > { %310 = vrot.lane.b32.xlu1 %v308_v4, %s723_s18  ;;  %295 = vrot.lane.b32.xlu0 %v293_v5, %s722_s17 }
 0x261   : > { %v281_v9 = vpop.permute.xlu1 %280 }
 0x262   : > { %v283_v13 = vadd.f32 %v281_v9, %v272_v8  ;;  %v266_v14 = vpop.permute.xlu0 %265 }
 0x263   : > { %v268_v15 = vadd.f32 %v266_v14, %v257_v10 }
 0x264   : > { %v284_v16 = vmul.f32 -2.0, %v283_v13  ;;  %v337_v30 = vmul.f32 2.0, %v283_v13 }
 0x265   : > { %v269_v17 = vmul.f32 2.0, %v268_v15  ;;  %v316_v18 = vmul.f32 -2.0, %v268_v15 }
 0x266   : > { %v311_v21 = vpop.permute.xlu1 %310  ;;  %v296_v22 = vpop.permute.xlu0 %295  ;;  %323 = vrot.lane.b32.xlu1 %v284_v16, %s721_s16 }
 0x267   : > { %v313_v24 = vadd.f32 %v311_v21, %v302_v19  ;;  %v285_v25 = vadd.f32 %v284_v16, %v269_v17  ;;  %v298_v26 = vadd.f32 %v296_v22, %v287_v20  ;;  %318 = vrot.lane.b32.xlu0 %v316_v18, %s721_s16 }
 0x269   : > { %v299_v27 = vmul.f32 -2.0, %v298_v26  ;;  %v314_v28 = vmul.f32 -2.0, %v313_v24 }
 0x26a   : > { %333 = vrot.lane.b32.xlu1 %v269_v17, %s720_s15 }
 0x26b   : > { %v300_v29 = vadd.f32 %v299_v27, %v285_v25  ;;  %328 = vrot.lane.b32.xlu0 %v299_v27, %s721_s16 }
 0x26d   : > { %v315_v31 = vadd.f32 %v314_v28, %v300_v29 }
 0x26e   : > { %343 = vrot.lane.b32.xlu1 %v269_v17, %s722_s17 }
 0x26f   : > { %339 = vrot.lane.b32.xlu0 %v337_v30, %s720_s15  ;;  %s621_s15 = scalar_lea.vmem %s620_s13, 128 }
 0x270   : > { %p623_p13 = scmp.lt.s32.totalorder %s621_s15, %s615_s14 }
 0x272   : > { %p624_p5 = por %p623_p13, %p622_p10 }
 0x274   : > { %p625_p7 = pnand %p624_p5, %p618_p2 }
 0x276   : > { %628 = shalt.err (!%p625_p7)
}
 0x277   : > { %s629_s16 = scalar_lea.hbm %s926_s11, 64  ;;  %s633_s19 = scalar_lea.hbm %s998_s2, 128 }
 0x278   : > { %p630_p8 = scmp.ne.s32.totalorder %s926_s11, %s629_s16  ;;  %p634_p3 = scmp.lt.u32.totalorder %s926_s11, %s998_s2 }
 0x279   : > { %p635_p4 = scmp.lt.u32.totalorder %s633_s19, %s629_s16  ;;  %p637_p9 = scmp.lt.u32.totalorder %s629_s16, %s926_s11 }
 0x27a   : > { %p631_p11 = pnand %p630_p8, %p1008_p0 }
 0x27b   : > { %p636_p6 = por %p635_p4, %p634_p3 }
 0x27c   : > { %p632_p12 = pneg %p631_p11 }
 0x27d   : > { %p638_p1 = por %p637_p9, %p636_p6 }
 0x27f   : > { %p639_p2 = pnand %p638_p1, %p632_p12 }
 0x281   : > { %642 = shalt.err (!%p639_p2)
}
 0x282   : > { %503 = dma.vmem_to_hbm [thread:$0]  (%p1008_p0), %s378_s4, 64, %s926_s11, %s360_s12   ;;  %vm357_vm5 = vcmask 516096  }
 0x283   : > { %s498_s26 = sshll.u32 %s782_s0, 4  ;;  %s173_s28 = scalar_lea.vmem [#allocation8], %s866_s10 }
 0x284   : > { %s390_s29 = sshll.u32 %s173_s28, 4  ;;  %s952_s9 = scalar_lea.hbm %s999_s3, %s498_s26  ;;  %s954_s29 = int_to_ptr.vmem [resolvable:$true] %s390_s29 }
 0x285   : > { %s365_s11 = scalar_lea.sflag [#allocation9], %s866_s10  ;;  %s643_s12 = scalar_lea.vmem %s954_s29, 16 }
 0x286   : > { %p644_p10 = scmp.ne.s32.totalorder %s954_s29, %s643_s12  ;;  %s728_s0 = smov [#allocation8]  }
 0x287   : > { %s647_s14 = sshll.u32 %s728_s0, 4  ;;  %s648_s14 = int_to_ptr.vmem [resolvable:$false] %s647_s14 }
 0x288   : > { %p645_p13 = pnand %p644_p10, %p1008_p0  ;;  %s649_s5 = scalar_lea.vmem %s648_s14, 32 }
 0x289   : > { %p650_p7 = scmp.lt.s32.totalorder %s954_s29, %s648_s14  ;;  %p651_p8 = scmp.lt.s32.totalorder %s649_s5, %s643_s12 }
 0x28a   : > { %p646_p5 = pneg %p645_p13 }
 0x28b   : > { %p652_p11 = por %p651_p8, %p650_p7 }
 0x28d   : > { %p653_p12 = pnand %p652_p11, %p646_p5 }
 0x2d8   : > { %v324_v23 = vpop.permute.xlu1 %323 }
 0x2d9   : > { %v319_v33 = vpop.permute.xlu0 %318 }
 0x2da   : > { %v321_v34 = vadd.f32 %v319_v33, %v315_v31 }
 0x2dc   : > { %v326_v35 = vadd.f32 %v324_v23, %v321_v34  ;;  %v334_v36 = vpop.permute.xlu1 %333 }
 0x2dd   : > { %v329_v37 = vpop.permute.xlu0 %328 }
 0x2de   : > { %v331_v38 = vadd.f32 %v329_v37, %v326_v35 }
 0x2e0   : > { %v336_v39 = vadd.f32 %v334_v36, %v331_v38  ;;  %v344_v42 = vpop.permute.xlu1 %343 }
 0x2e1   : > { %v340_v40 = vpop.permute.xlu0 %339 }
 0x2e2   : > { %v342_v41 = vadd.f32 %v340_v40, %v336_v39 }
 0x2e4   : > { %v346_v43 = vadd.f32 %v344_v42, %v342_v41 }
 0x2e6   : > { %v347_v44 = vsel %vm176_vm0, %v346_v43, 0.0 }
 0x2e7   : > { %v348_v45 = vrot.slane %v347_v44, 4 }
 0x2e9   : > { %v349_v46 = vadd.f32 %v348_v45, %v347_v44 }
 0x2eb   : > { %v350_v47 = vrot.slane %v349_v46, 2 }
 0x2ed   : > { %v351_v48 = vadd.f32 %v350_v47, %v349_v46 }
 0x2ef   : > { %v352_v49 = vrot.slane %v351_v48, 1 }
 0x2f1   : > { %v353_v50 = vadd.f32 %v352_v49, %v351_v48 }
 0x2f3   : > { %v354_v51 = vmul.f32 1.442695, %v353_v50 }
 0x2f5   : > { %v355_v52 = vsub.f32 0.0, %v354_v51 }
 0x2f7   : > { %v356_v53 = vmul.f32 0.04, %v355_v52 }
 0x2f9   : > { %358 = vst.msk [vmem:[%s173_s28] sm:$0x1] %vm357_vm5, %v356_v53 }
 0x2fa   : > { %656 = shalt.err (!%p653_p12)
}
 0x2fb   : > { %s657_s10 = scalar_lea.hbm %s952_s9, 16  ;;  %s661_s16 = scalar_lea.hbm %s999_s3, 32 }
 0x2fc   : > { %p658_p3 = scmp.ne.s32.totalorder %s952_s9, %s657_s10  ;;  %p662_p9 = scmp.lt.u32.totalorder %s952_s9, %s999_s3 }
 0x2fd   : > { %p663_p1 = scmp.lt.u32.totalorder %s661_s16, %s657_s10  ;;  %p665_p10 = scmp.lt.u32.totalorder %s657_s10, %s952_s9 }
 0x2fe   : > { %p659_p4 = pnand %p658_p3, %p1008_p0 }
 0x2ff   : > { %p664_p2 = por %p663_p1, %p662_p9 }
 0x300   : > { %p660_p6 = pneg %p659_p4 }
 0x301   : > { %p666_p13 = por %p665_p10, %p664_p2 }
 0x303   : > { %p667_p5 = pnand %p666_p13, %p660_p6 }
 0x305   : > { %670 = shalt.err (!%p667_p5)
}
 0x306   : > { %504 = dma.vmem_to_hbm [thread:$0]  (%p1008_p0), %s954_s29, 16, %s952_s9, %s365_s11  }
 0x307 PF: > { %s402_s19 = sand.u32 1, %s703_s22   ;;  %p1009_p7 = scmp.ne.s32.totalorder %s1004_s7, 0 }
 0x308   : > { %p1010_p8 = scmp.ge.s32.totalorder %s715_s25, 2  ;;  %s403_s20 = scalar_lea.sflag [#allocation6], %s402_s19 }
 0x30a   : > { %p512_p11 = pnand %p1010_p8, %p1009_p7 }
 0x30c   : > { %694 = dma.done.wait (!%p512_p11), %s403_s20, 64  }
 0x30d   : > { %696 = vsyncadd (!%p512_p11), %s403_s20, 4294967232  ;;  %s412_s21 = scalar_lea.sflag [#allocation9], %s402_s19 }
 0x30e   : > { %698 = dma.done.wait (!%p512_p11), %s412_s21, 16  }
 0x30f   : > { %700 = vsyncadd (!%p512_p11), %s412_s21, 4294967280  ;;  %p24_p0 = scmp.ge.s32.totalorder %s786_s27, 4   ;;  %s1011_s22 = smov %s707_s23 }
 0x310   : > { %s1012_s23 = smov %s711_s24  ;;  %s1013_s24 = smov %s798_s30 }
 0x311   : > { %s1014_s25 = smov %s786_s27  ;;  %26 = sbr.rel (!%p24_p0) target bundleno = 19 (0x13), region = 86 }
 0x318   :  { %416 = vsyncpa [#allocation5], 1 }
 0x319   :  { %418 = vsyncpa [#allocation5 + $0x1], 1 }
 0x31a   :  { %419 = vsyncpa [#allocation6], 1 }
 0x31b   :  { %421 = vsyncpa [#allocation6 + $0x1], 1 }
 0x31c   :  { %422 = vsyncpa [#allocation9], 1 }
 0x31d   :  { %424 = vsyncpa [#allocation9 + $0x1], 1 }

</bundles_post_ra>
